<compile_context>
chip_gen: v5e
topology: v5e:2x2
jax: 0.10.0
libtpu: 0.0.40
codegen_flags: <defaults>
</compile_context>

<pallas_src>
import functools
import math

import jax
import jax.numpy as jnp
from jax.experimental import pallas as pl
from jax.experimental.pallas import tpu as pltpu


def _pick_block(total, max_block=512):
    """Largest multiple-of-128 block (<= max_block) dividing `total`; falls
    back to `total` for tiny problems (full-dim blocks are always legal).
    If the whole extent fits in one block, split it in two when both halves
    stay lane-dense so a v7x chip can use both TensorCores."""
    block = total
    for cand in range(min(max_block, total), 127, -128):
        if total % cand == 0:
            block = cand
            break
    if block == total and total % 256 == 0:
        block = total // 2
    return block


# ----------------------------------------------------------------------------
# Kernel 1: qkv 1x1-conv (+ every folded BN affine) as one MXU matmul.
# ----------------------------------------------------------------------------
def _qkv_proj_kernel(x_ref, w_ref, o_ref):
    # (2*OP, C+1) @ (C+1, TM); the extra ones-row of x carries the folded bias.
    o_ref[...] = jnp.dot(w_ref[...], x_ref[...],
                         preferred_element_type=jnp.float32).astype(o_ref.dtype)


# ----------------------------------------------------------------------------
# Kernel 2: axial (H-axis) attention over a lane-dense block of columns.
# ----------------------------------------------------------------------------
def _axial_attn_kernel(qkv_ref, qe_ref, keT_ref, ve_ref, o_ref, *,
                       groups, group_planes):
    G, gp = groups, group_planes
    gph = gp // 2
    nq = G * gph                      # number of q rows (== number of k rows)

    # Row layout of qkv_ref (built in init_params): channel-major
    #   [ q: c*G+g | k: nq + c*G+g | v: 2*nq + c*G+g ]
    # so every per-channel access below is a contiguous leading-axis slice.
    for g in range(G):                                   # tiny, unrolled
        # logits[i, j, l] = sum_c q*(k + qe) + k*keT     (BN scales folded)
        logits = None
        for c in range(gph):
            qgc = qkv_ref[c * G + g]                     # (H_i, L)
            kgc = qkv_ref[nq + c * G + g]                # (H_j, L)
            term = (qgc[:, None, :] * (kgc[None, :, :] + qe_ref[c, g])
                    + kgc[None, :, :] * keT_ref[c, g])   # (H_i, H_j, L)
            logits = term if logits is None else logits + term

        # Softmax over the key axis j; divide on the EUP, not the VALU.
        m = jnp.max(logits, axis=1, keepdims=True)
        e = jnp.exp(logits - m)
        sim = e * pl.reciprocal(jnp.sum(e, axis=1, keepdims=True), approx=True)

        # out[c, i, l] = sum_j sim * (v + ve)             (bn_output folded)
        # NOTE: at production sizes (H >= 56, gp >= 16) these c/j contractions
        # should move to the MXU (batched dot_general); at H=8/gp=4 the VPU
        # path is the right unit.
        for c in range(gp):
            vgc = qkv_ref[2 * nq + c * G + g]            # (H_j, L)
            o_ref[c, g] = jnp.sum(sim * (vgc[None, :, :] + ve_ref[c, g]),
                                  axis=1)                # (H_i, L) lane-dense


# ----------------------------------------------------------------------------
# Wrapper
# ----------------------------------------------------------------------------
def axial_attention_forward(x_nchw, params, *, groups, out_planes,
                            compute_dtype=jnp.float32):
    N, C, H, W = x_nchw.shape
    G = groups
    gp = out_planes // groups
    gph = gp // 2
    OP2 = 2 * out_planes
    assert out_planes % groups == 0 and gp % 2 == 0

    # ---- layout plumbing (wrapper-side, outside the kernels) --------------
    # x: (N, C, H, W) -> (C, H*N*W); column order (h, n, w) puts (n, w) on the
    # lane axis for the attention.  Append a ones row so the bias rides the
    # matmul (no lane-sparse (2*OP, 1) operand).
    M = H * N * W
    x_cols = jnp.transpose(x_nchw, (1, 2, 0, 3)).reshape(C, M)
    x_aug = jnp.concatenate([x_cols, jnp.ones((1, M), x_cols.dtype)], axis=0)
    x_aug = x_aug.astype(compute_dtype)
    w_aug = params["w_aug"].astype(compute_dtype)        # (2*OP, C+1)

    # ---- kernel 1: qkv projection over the flat column axis ---------------
    TM = _pick_block(M, max_block=2048)
    qkv = pl.pallas_call(
        _qkv_proj_kernel,
        out_shape=jax.ShapeDtypeStruct((OP2, M), jnp.float32),
        grid=(M // TM,),
        in_specs=[pl.BlockSpec((C + 1, TM), lambda i: (0, i)),
                  pl.BlockSpec((OP2, C + 1), lambda i: (0, 0))],
        out_specs=pl.BlockSpec((OP2, TM), lambda i: (0, i)),
        compiler_params=pltpu.CompilerParams(
            dimension_semantics=("parallel",)),
    )(x_aug, w_aug)

    # Free (contiguous) HBM reshape: columns are already ordered (h, n, w).
    qkv3 = qkv.reshape(OP2, H, N * W)

    # ---- kernel 2: axial attention over lane-dense column blocks ----------
    L = _pick_block(N * W, max_block=512)
    kern = functools.partial(_axial_attn_kernel, groups=G, group_planes=gp)
    out = pl.pallas_call(
        kern,
        out_shape=jax.ShapeDtypeStruct((gp, G, H, N * W), jnp.float32),
        grid=(N * W // L,),
        in_specs=[
            pl.BlockSpec((OP2, H, L), lambda b: (0, 0, b)),
            pl.BlockSpec((gph, G, H, H, 1), lambda b: (0, 0, 0, 0, 0)),
            pl.BlockSpec((gph, G, H, H, 1), lambda b: (0, 0, 0, 0, 0)),
            pl.BlockSpec((gp, G, H, H, 1), lambda b: (0, 0, 0, 0, 0)),
        ],
        out_specs=pl.BlockSpec((gp, G, H, L), lambda b: (0, 0, 0, b)),
        compiler_params=pltpu.CompilerParams(
            dimension_semantics=("parallel",)),
    )(qkv3, params["qe"], params["keT"], params["ve"])

    # (gp, G, H, N, W) -> (N, G, gp, H, W) -> (N, out_planes, H, W)
    out = out.reshape(gp, G, H, N, W)
    out = jnp.transpose(out, (3, 1, 0, 2, 4)).reshape(N, out_planes, H, W)
    return out


# ----------------------------------------------------------------------------
# Parameters (reset_parameters init) with every BatchNorm folded in.
# ----------------------------------------------------------------------------
def init_params(key, *, in_planes, out_planes, groups, kernel_size):
    G = groups
    gp = out_planes // groups
    gph = gp // 2
    K = kernel_size
    OP2 = 2 * out_planes
    eps = 1e-5
    k_w, k_rel = jax.random.split(key)

    # reset_parameters(): qkv weight ~ N(0, 1/in_planes), relative ~ N(0, 1/gp)
    w_qkv = jax.random.normal(k_w, (OP2, in_planes), jnp.float32) \
        * math.sqrt(1.0 / in_planes)
    relative = jax.random.normal(k_rel, (2 * gp, 2 * K - 1), jnp.float32) \
        * math.sqrt(1.0 / gp)

    # TODO(synk): BatchNorms use inference-mode running stats (defaults) folded
    # to per-channel affines; training-mode batch statistics are not reproduced.
    def bn_affine(nch):
        gamma = jnp.ones((nch,), jnp.float32)
        beta = jnp.zeros((nch,), jnp.float32)
        mean = jnp.zeros((nch,), jnp.float32)
        var = jnp.ones((nch,), jnp.float32)
        s = gamma / jnp.sqrt(var + eps)
        return s, beta - mean * s

    # Relative positional embeddings (torch.index_select gather).
    qi = jnp.arange(K)[None, :]
    ki = jnp.arange(K)[:, None]
    flat_idx = (ki - qi + K - 1).reshape(-1)
    all_emb = jnp.take(relative, flat_idx, axis=1).reshape(2 * gp, K, K)
    q_emb = all_emb[:gph]                                   # [c, i, j]
    k_embT = jnp.transpose(all_emb[gph:gp], (0, 2, 1))      # [c, i, j] = k_emb[c, j, i]
    v_emb = all_emb[gp:]                                    # [c, i, j]

    # --- fold every BatchNorm into the operands -----------------------------
    s_bnq, b_bnq = bn_affine(OP2)                           # bn_qkv
    s_sim = bn_affine(3 * G)[0]                             # bn_similarity
    # (bn_similarity bias is constant over the softmax axis -> cancels.)
    s_qk, s_qr, s_kr = s_sim[:G], s_sim[G:2 * G], s_sim[2 * G:]
    s_out, b_out = bn_affine(OP2)                           # bn_output
    s_sv = s_out[0::2].reshape(G, gp)                       # channel 2*(g*gp+c)
    s_sve = s_out[1::2].reshape(G, gp)                      # channel 2*(g*gp+c)+1
    b_o = (b_out[0::2] + b_out[1::2]).reshape(G, gp)

    w_bn = w_qkv * s_bnq[:, None]
    b_bn = b_bnq

    # Channel-major [q | k | v] row ordering: new row index = c*G + g.
    g_idx = jnp.arange(G)[None, :]

    def rows(off, nch):
        c_idx = jnp.arange(nch)[:, None]
        return (g_idx * (2 * gp) + off + c_idx).reshape(-1)

    q_rows, k_rows, v_rows = rows(0, gph), rows(gph, gph), rows(gp, gp)

    sqk_cg = jnp.tile(s_qk, gph)              # row (c*G+g) -> s_qk[g]
    ssv_cg = s_sv.T.reshape(-1)               # row (c*G+g) -> s_sv[g, c]
    bo_cg = b_o.T.reshape(-1)

    # q rows carry s_qk (qk branch scale); v rows carry s_sv plus the summed
    # bn_output bias (softmax rows sum to 1, so a bias on v is a bias on out).
    w_folded = jnp.concatenate([
        w_bn[q_rows] * sqk_cg[:, None],
        w_bn[k_rows],
        w_bn[v_rows] * ssv_cg[:, None],
    ], axis=0)
    b_folded = jnp.concatenate([
        b_bn[q_rows] * sqk_cg,
        b_bn[k_rows],
        b_bn[v_rows] * ssv_cg + bo_cg,
    ], axis=0)
    # Bias rides the matmul: extra "input channel" of ones.
    w_aug = jnp.concatenate([w_folded, b_folded[:, None]], axis=1)   # (2*OP, C+1)

    # Per-group scaled embedding copies, channel-major leading, trailing
    # 1-lane axis for a cheap in-kernel lane splat.  (Requires s_qk != 0,
    # true for any non-degenerate BatchNorm.)
    qe = (s_qr / s_qk)[None, :, None, None] * q_emb[:, None]   # (gph, G, K, K)
    keT = s_kr[None, :, None, None] * k_embT[:, None]          # (gph, G, K, K)
    ve = s_sve.T[:, :, None, None] * v_emb[:, None]            # (gp,  G, K, K)

    folded = dict(w_aug=w_aug, qe=qe[..., None], keT=keT[..., None],
                  ve=ve[..., None])
    raw = dict(w_qkv=w_qkv, relative=relative)
    return folded, raw


# ----------------------------------------------------------------------------
# Pure-JAX transcription of the PyTorch module (eval-mode BatchNorm) for check.
# ----------------------------------------------------------------------------
def reference_forward(x_nchw, raw, *, groups, out_planes, eps=1e-5):
    N, C, H, W = x_nchw.shape
    G, gp = groups, out_planes // groups
    gph = gp // 2
    K = H
    s = 1.0 / math.sqrt(1.0 + eps)        # every eval-mode BN: identity stats

    xb = jnp.transpose(x_nchw, (0, 3, 1, 2)).reshape(N * W, C, H)
    qkv = s * jnp.einsum('oc,bch->boh', raw["w_qkv"], xb)
    qkv = qkv.reshape(N * W, G, 2 * gp, H)
    q, k, v = qkv[:, :, :gph], qkv[:, :, gph:gp], qkv[:, :, gp:]

    qi = jnp.arange(K)[None, :]
    ki = jnp.arange(K)[:, None]
    flat_idx = (ki - qi + K - 1).reshape(-1)
    all_emb = jnp.take(raw["relative"], flat_idx, axis=1).reshape(2 * gp, K, K)
    q_emb, k_emb, v_emb = all_emb[:gph], all_emb[gph:gp], all_emb[gp:]

    qr = jnp.einsum('bgci,cij->bgij', q, q_emb)
    kr = jnp.swapaxes(jnp.einsum('bgci,cij->bgij', k, k_emb), 2, 3)
    qk = jnp.einsum('bgci,bgcj->bgij', q, k)
    sim = jax.nn.softmax(s * (qk + qr + kr), axis=3)
    sv = jnp.einsum('bgij,bgcj->bgci', sim, v)
    sve = jnp.einsum('bgij,cij->bgci', sim, v_emb)
    out = s * (sv + sve)                                    # (B, G, gp, H)
    out = out.reshape(N, W, out_planes, H)
    return jnp.transpose(out, (0, 2, 3, 1))                 # (N, OP, H, W)


if __name__ == "__main__":
    # AxialAttention(in_planes=8, out_planes=16, groups=4, kernel_size=[8, 8],
    # stride=1, width=False) on a (2, 8, 8, 16) NCHW input.
    N, in_planes, out_planes, groups = 2, 8, 16, 4
    H, W = 8, 16                            # kernel_size[0] == H (width=False)

    key = jax.random.PRNGKey(0)
    k_x, k_p = jax.random.split(key)
    x = jax.random.normal(k_x, (N, in_planes, H, W), jnp.float32)   # NCHW
    folded, raw = init_params(k_p, in_planes=in_planes, out_planes=out_planes,
                              groups=groups, kernel_size=H)

    # compute_dtype=jnp.bfloat16 is the production setting for the projection
    # matmul; f32 here keeps the tight tolerance check trivially safe.
    out = axial_attention_forward(x, folded, groups=groups,
                                  out_planes=out_planes,
                                  compute_dtype=jnp.float32)
    out = jax.block_until_ready(out)
    assert out.shape == (N, out_planes, H, W), out.shape
    assert bool(jnp.all(jnp.isfinite(out)))

    ref = reference_forward(x, raw, groups=groups, out_planes=out_planes)
    assert bool(jnp.allclose(out, ref, rtol=1e-2, atol=1e-2)), \
        float(jnp.max(jnp.abs(out - ref)))
    print("KERNEL_OK")
</pallas_src>

<mosaic_0001>
module attributes {stable_mosaic.version = 11 : i64} {
  func.func @_qkv_proj_kernel(%arg0: i32, %arg1: memref<9x128xf32, #tpu.memory_space<vmem>>, %arg2: memref<32x9xf32, #tpu.memory_space<vmem>>, %arg3: memref<32x128xf32, #tpu.memory_space<vmem>>) attributes {dimension_semantics = [#tpu.dimension_semantics<parallel>], iteration_bounds = array<i64: 2>, scalar_prefetch = 0 : i64, scratch_operands = 0 : i64, tpu.core_type = #tpu.core_type<tc>, window_params = [{transform_indices = @transform_0, window_bounds = array<i64: 9, 128>}, {pipeline_mode = #tpu.pipeline_mode<synchronous>, transform_indices = @transform_1, window_bounds = array<i64: 32, 9>}, {transform_indices = @transform_2, window_bounds = array<i64: 32, 128>}]} {
    %c0 = arith.constant 0 : index
    %c0_0 = arith.constant 0 : index
    %0 = vector.load %arg2[%c0, %c0_0] : memref<32x9xf32, #tpu.memory_space<vmem>>, vector<32x9xf32>
    %c0_1 = arith.constant 0 : index
    %c0_2 = arith.constant 0 : index
    %1 = vector.load %arg1[%c0_1, %c0_2] : memref<9x128xf32, #tpu.memory_space<vmem>>, vector<9x128xf32>
    %cst = arith.constant dense<0.000000e+00> : vector<32x128xf32>
    %2 = tpu.matmul %0, %1, %cst {dimension_numbers = #tpu.dot_dimension_numbers<[1], [0], [0], [1], [0, 0, 1, 1], [], []>} : vector<32x9xf32>, vector<9x128xf32>, vector<32x128xf32> -> vector<32x128xf32>
    %c0_3 = arith.constant 0 : index
    %c0_4 = arith.constant 0 : index
    %3 = vector.load %arg3[%c0_3, %c0_4] : memref<32x128xf32, #tpu.memory_space<vmem>>, vector<32x128xf32>
    tpu.vector_store %arg3[%c0_3, %c0_4], %2 {strides = array<i32>} : memref<32x128xf32, #tpu.memory_space<vmem>>, vector<32x128xf32>,
    return
  }
  func.func @transform_0(%arg0: i32) -> (i32, i32) {
    %c0_i32 = arith.constant 0 : i32
    %c0_i32_0 = arith.constant 0 : i32
    return %c0_i32, %arg0 : i32, i32
  }
  func.func @transform_1(%arg0: i32) -> (i32, i32) {
    %c0_i32 = arith.constant 0 : i32
    %c0_i32_0 = arith.constant 0 : i32
    %c0_i32_1 = arith.constant 0 : i32
    return %c0_i32, %c0_i32_0 : i32, i32
  }
  func.func @transform_2(%arg0: i32) -> (i32, i32) {
    %c0_i32 = arith.constant 0 : i32
    %c0_i32_0 = arith.constant 0 : i32
    return %c0_i32, %arg0 : i32, i32
  }
}

</mosaic_0001>

<bundles_post_ra>
// kernel: tpu_custom_call.1
= control target key start
LH: loop header
LB: loop body
LE: loop exit
PB: predicated region body
PF: predicated region fallthrough
CT: control target
= control target key end

     0   :  { %7 = vsyncpa [#allocation4], 0  ;;  %s577_s0 = inlined_call_operand.vmem [shape: f32[9,256], index: 0, kind: input, shape index: {}]   ;;  %s578_s1 = inlined_call_operand.vmem [shape: f32[32,9], index: 1, kind: input, shape index: {}]   ;;  %s579_s2 = inlined_call_operand.hbm [shape: f32[32,256], index: 2, kind: output, shape index: {}]  }
   0x1   :  { %9 = vsyncpa [#allocation4 + $0x1], 0  ;;  %s467_s9 = smov 0   ;;  %s469_s10 = smov 0  }
   0x2   :  { %s471_s11 = smov 0   ;;  %s473_s12 = smov 0  }
   0x3 LB: > { %s319_s13 = sadd.s32 4294967295, %s447_s12   ;;  %s320_s14 = sadd.s32 4294967294, %s447_s12   ;;  %s447_s12 = sphi %s473_s12, %s585_s12   ;;  %s443_s11 = sphi %s471_s11, %s584_s11   ;;  %s439_s10 = sphi %s469_s10, %s583_s10   ;;  %s435_s9 = sphi %s467_s9, %s582_s9  }
   0x4   : > { %s490_s15 = sadd.s32 1, %s447_s12   ;;  %s22_s16 = sadd.s32 1, %s443_s11 }
   0x5   : > { %s19_s17 = ssub.s32 %s447_s12, %s490_s15  ;;  %p29_p0 = scmp.ne.s32.totalorder %s443_s11, %s439_s10 }
   0x6   : > { %p20_p1 = scmp.eq.s32.totalorder %s19_s17, 0  ;;  %p30_p2 = scmp.eq.s32.totalorder %s447_s12, 0 }
   0x7   : > { %p80_p3 = scmp.eq.s32.totalorder %s319_s13, 1  ;;  %p85_p4 = scmp.ne.s32.totalorder %s439_s10, %s435_s9 }
   0x8   : > { %s503_s18 = scalar_select %p20_p1, %s443_s11, %s22_s16  }
   0x9   : > { %p31_p5 = por %p30_p2, %p29_p0  ;;  %p505_p6 = por %p80_p3, %p29_p0 }
   0xa   : > { %p86_p7 = scmp.eq.s32.totalorder %s320_s14, 1  ;;  %p322_p9 = scmp.ge.s32.totalorder %s447_s12, 2 }
   0xc   : > { %p509_p8 = por %p86_p7, %p85_p4  ;;  %105 = sbr.rel (%p322_p9) target bundleno = 23 (0x17), region = 20 }
  0x11   : > { %108 = sbr.rel (!%p31_p5) target bundleno = 23 (0x17), region = 24  ;;  %s110_s21 = sand.u32 (%p31_p5), 1, %s443_s11  }
  0x12   : > { %s324_s22 = sshll.u32 (%p31_p5), %s447_s12, 3  ;;  %s323_s23 = sshll.u32 (%p31_p5), %s110_s21, 4 }
  0x13   : > { %s114_s26 = scalar_lea.vmem (%p31_p5), %s577_s0, %s324_s22  ;;  %s112_s27 = scalar_lea.vmem (%p31_p5), [#allocation2], %s323_s23 }
  0x14   : > { %v145_v0 = vld [vmem:[%s114_s26] sm:$0xff] (%p31_p5)  ;;  %v147_v1 = vld [vmem:[%s114_s26 + $0x10] sm:$0xff] (%p31_p5) }
  0x15   : > { %146 = vst [vmem:[%s112_s27] sm:$0xff] (%p31_p5), %v145_v0 }
  0x16   : > { %148 = vst [vmem:[%s112_s27 + $0x8] sm:$0xff] %v147_v1 }
  0x17 PF: > { %p325_p10 = scmp.ge.s32.totalorder %s447_s12, 1  ;;  %p153_p11 = scmp.lt.s32.totalorder %s447_s12, 3 }
  0x19   : > { %p154_p12 = pnand %p325_p10, %p153_p11 }
  0x1a   : > { %s524_s28 = sand.u32 (!%p154_p12), 1, %s439_s10   ;;  %s334_s21 = sshll.u32 (!%p154_p12), %s319_s13, 3 }
  0x1b   : > { %157 = sbr.rel (%p154_p12) target bundleno = 174 (0xae), region = 62  ;;  %s326_s29 = sshll.u32 (!%p154_p12), %s524_s28, 4 }
  0x1c   : > { %s162_s30 = scalar_lea.vmem (!%p154_p12), [#allocation2], %s326_s29  ;;  %s327_s17 = sshll.u32 (!%p154_p12), %s524_s28, 5 }
  0x1d   : > { %s248_s24 = scalar_lea.hbm (!%p154_p12), %s579_s2, %s334_s21  ;;  %s180_s25 = scalar_lea.vmem (!%p154_p12), [#allocation3], %s327_s17 }
  0x1e   : > { %s249_s26 = sshll.u32 (!%p154_p12), %s180_s25, 4  ;;  %s545_s27 = sshll.u32 (!%p154_p12), %s248_s24, 4  ;;  %s250_s26 = int_to_ptr.vmem [resolvable:$true] %s249_s26  ;;  %s252_s27 = int_to_ptr.hbm [resolvable:$true] %s545_s27 }
  0x1f   : > { %s238_s13 = scalar_lea.sflag (!%p154_p12), [#allocation4], %s524_s28  ;;  %s399_s29 = sshra.s32 (!%p154_p12), %s252_s27, 4  ;;  %s400_s29 = int_to_ptr.hbm [resolvable:$true] %s399_s29 }
  0x20   : > { %vm200_vm0 = vcmask 1040384   ;;  %v186_v2 = vld [vmem:[%s162_s30 + $0x8] sm:$0x1]  ;;  %v185_v3 = vld [vmem:[%s162_s30] sm:$0xff]  ;;  %vm187_vm1 = vcmask 72704   ;;  %s401_s30 = scalar_lea.hbm %s400_s29, 32  ;;  %p406_p2 = scmp.lt.s32.totalorder %s400_s29, %s579_s2 }
  0x21   : > { %338 = vmatpush.msk.msra.mxu2 %vm200_vm0, %v186_v2  ;;  %339 = vmatpush.msk.msra.mxu3 %vm200_vm0, %v186_v2  ;;  %v183_v4 = vld [vmem:[%s578_s1 + $0x10] sm:$0xff]  ;;  %v184_v5 = vld [vmem:[%s578_s1 + $0x18] sm:$0xff]  ;;  %v181_v6 = vld [vmem:[%s578_s1] sm:$0xff]  ;;  %p402_p13 = scmp.ne.s32.totalorder %s400_s29, %s401_s30  ;;  %s405_s5 = scalar_lea.hbm %s579_s2, 64 }
  0x22   : > { %328 = vmatpush.msk.msra.mxu0 %vm200_vm0, %v186_v2  ;;  %337 = vmatpush.msk.msra.mxu1 %vm200_vm0, %v186_v2  ;;  %v182_v7 = vld [vmem:[%s578_s1 + $0x8] sm:$0xff]  ;;  %p407_p3 = scmp.lt.s32.totalorder %s405_s5, %s401_s30 }
  0x23   : > { %341 = vmatpush.msra.mxu2 %v185_v3  ;;  %342 = vmatpush.msra.mxu3 %v185_v3  ;;  %p403_p0 = pnand %p402_p13, %p505_p6 }
  0x24   : > { %331 = vmatmul.msk.f32.vlgmr.msra.gmra.mxu2 %vm187_vm1, %v183_v4  ;;  %332 = vmatmul.msk.f32.vlgmr.msra.gmra.mxu3 %vm187_vm1, %v184_v5  ;;  %p408_p4 = por %p407_p3, %p406_p2 }
  0x25   : > { %219 = vmatpush.msra.mxu0 %v185_v3  ;;  %340 = vmatpush.msra.mxu1 %v185_v3  ;;  %p404_p1 = pneg %p403_p0 }
  0x26   : > { %329 = vmatmul.msk.f32.vlgmr.msra.gmra.mxu0 %vm187_vm1, %v181_v6  ;;  %330 = vmatmul.msk.f32.vlgmr.msra.gmra.mxu1 %vm187_vm1, %v182_v7 }
  0x27   : > { %p409_p5 = pnand %p408_p4, %p404_p1 }
  0xa3   : > { %v221_v8 = vpop.f32.mrf.mxu0  ;;  %v224_v9 = vpop.f32.mrf.mxu1 }
  0xa4   : > { %233 = vst [vmem:[%s180_s25] sm:$0xff] %v221_v8 }
  0xa5   : > { %234 = vst [vmem:[%s180_s25 + $0x8] sm:$0xff] %v224_v9 }
  0xa7   : > { %v227_v10 = vpop.f32.mrf.mxu2  ;;  %v230_v11 = vpop.f32.mrf.mxu3 }
  0xa8   : > { %235 = vst [vmem:[%s180_s25 + $0x10] sm:$0xff] %v227_v10 }
  0xa9   : > { %236 = vst [vmem:[%s180_s25 + $0x18] sm:$0xff] %v230_v11 }
  0xaa   : > { %412 = shalt.err (!%p409_p5)
}
  0xab   : > { %s449_s28 = smov 128   ;;  %s450_s8 = smov 256  }
  0xac   : > { %s451_s14 = smov 8  }
  0xad   : > { %343 = dma.vmem_to_hbm [thread:$0]  (%p505_p6), %s250_s26, 512, %s252_s27, %s238_s13, %s449_s28, %s450_s8, %s451_s14  }
  0xae PF: > { %s266_s16 = sand.u32 1, %s435_s9   ;;  %p346_p7 = pnand %p322_p9, %p509_p8 }
  0xaf   : > { %s267_s17 = scalar_lea.sflag [#allocation4], %s266_s16 }
  0xb0   : > { %p347_p10 = pneg %p346_p7 }
  0xb2   : > { %430 = dma.done.wait (%p347_p10), %s267_s17, 512  }
  0xb3   : > { %432 = vsyncadd (%p347_p10), %s267_s17, 4294966784  ;;  %p12_p11 = scmp.ge.s32.totalorder %s490_s15, 4   ;;  %s582_s9 = smov %s439_s10 }
  0xb4   : > { %s583_s10 = smov %s443_s11  ;;  %s584_s11 = smov %s503_s18 }
  0xb5   : > { %s585_s12 = smov %s490_s15  ;;  %14 = sbr.rel (!%p12_p11) target bundleno = 3 (0x3), region = 106 }
  0xba   :  { %273 = vsyncpa [#allocation4], 1 }
  0xbb   :  { %275 = vsyncpa [#allocation4 + $0x1], 1 }

</bundles_post_ra>
